<compile_context>
chip_gen: v7x
topology: tpu7x:2x2x1
jax: 0.10.0
libtpu: 0.0.40
codegen_flags: <defaults>
</compile_context>

<pallas_src>
import math

import jax
import jax.numpy as jnp
from jax.experimental import pallas as pl
from jax.experimental.pallas import tpu as pltpu

_LANE = 128
_SUBLANE = 8


def _dyt_kernel(x_ref, p_ref, o_ref):
    # Pure VPU/EUP hot path on one VMEM tile; params broadcast over rows.
    x = x_ref[...]
    p = p_ref[...]
    a = p[0:1, :]
    g = p[1:2, :]
    b = p[2:3, :]
    t = p[3:4, :]
    o_ref[...] = (g * jnp.tanh(a * x + b) + t).astype(o_ref.dtype)


def _round_up(v, m):
    return (v + m - 1) // m * m


def dyt_forward(x, alpha, gamma, beta, theta, *, target_tile_bytes=2 << 20):
    """x: (..., H); params: (H,) each. Returns same shape/dtype as x."""
    orig_shape = x.shape
    H = orig_shape[-1]
    assert alpha.shape == (H,) and gamma.shape == (H,)
    assert beta.shape == (H,) and theta.shape == (H,)

    x2 = x.reshape(-1, H)
    R = x2.shape[0]
    if R == 0:
        return x  # degenerate empty input

    # Fold k original rows into one lane-dense row so the block's last dim
    # (W = k*H) is a multiple of 128.
    k = _LANE // math.gcd(H, _LANE)
    W = k * H

    # Pack alpha/gamma/beta/theta into a single (4, W) slab, tiled k times so
    # it lines up with the folded lane layout (lane j*H + h <- feature h).
    params = jnp.stack([alpha, gamma, beta, theta], axis=0).astype(jnp.float32)
    if k > 1:
        params = jnp.tile(params, (1, k))

    itemsize = jnp.dtype(x.dtype).itemsize
    bytes_per_row = W * itemsize
    Rf = -(-R // k)  # folded rows needed

    # Row tile: aim for ~target_tile_bytes of x per grid step, but pick the
    # tile by splitting Rf into the minimal number of near-equal tiles so the
    # zero-padded tail is < 8 folded rows per tile (not up to a whole tile).
    row_tile_max = max(
        _SUBLANE, (target_tile_bytes // max(bytes_per_row, 1)) // _SUBLANE * _SUBLANE
    )
    n_tiles = -(-Rf // row_tile_max)
    row_tile = _round_up(-(-Rf // n_tiles), _SUBLANE)
    Rf_pad = row_tile * n_tiles
    R_pad = Rf_pad * k

    if R_pad != R:
        x2 = jnp.pad(x2, ((0, R_pad - R), (0, 0)))
    xf = x2.reshape(Rf_pad, W)

    grid = (n_tiles,)

    # VMEM budget: double-buffered in + out tiles + params, with slack.
    # >= 32 MiB lifts the low default scoped limit (v5e: 16 MiB), <= 48 MiB
    # leaves headroom on v7x's 64 MiB per-TC VMEM.
    tile_bytes = row_tile * W * itemsize
    vmem_limit = int(min(48 << 20, max(32 << 20, 6 * tile_bytes)))

    out = pl.pallas_call(
        _dyt_kernel,
        out_shape=jax.ShapeDtypeStruct((Rf_pad, W), x.dtype),
        grid_spec=pltpu.PrefetchScalarGridSpec(
            num_scalar_prefetch=0,
            grid=grid,
            in_specs=[
                pl.BlockSpec((row_tile, W), lambda i: (i, 0)),  # x (folded)
                pl.BlockSpec((4, W), lambda i: (0, 0)),         # packed params
            ],
            out_specs=pl.BlockSpec((row_tile, W), lambda i: (i, 0)),
        ),
        compiler_params=pltpu.CompilerParams(
            dimension_semantics=("parallel",),  # shards rows across v7x TCs
            vmem_limit_bytes=vmem_limit,
        ),
    )(xf, params)

    out = out.reshape(R_pad, H)[:R]
    return out.reshape(orig_shape)


if __name__ == "__main__":
    key = jax.random.PRNGKey(0)

    batch, seq, hidden = 2, 8, 32   # input_size = hidden = 32
    x = jax.random.normal(key, (batch, seq, hidden), dtype=jnp.float32)

    # Deterministic parameter init mirroring Dyt.__init__:
    alpha = jnp.ones((hidden,), dtype=jnp.float32)          # torch.ones
    gamma = jnp.ones((hidden,), dtype=jnp.float32) * 2.0    # torch.ones * 2
    beta = jnp.zeros((hidden,), dtype=jnp.float32)          # torch.zeros
    theta = jnp.zeros((hidden,), dtype=jnp.float32)         # torch.zeros

    y = dyt_forward(x, alpha, gamma, beta, theta)
    y = jax.block_until_ready(y)

    # Reference check (plain JAX).
    y_ref = gamma * jnp.tanh(alpha * x + beta) + theta
    assert y.shape == x.shape and y.dtype == x.dtype
    assert jnp.allclose(y, y_ref, atol=1e-5, rtol=1e-5), "mismatch vs reference"

    print("KERNEL_OK")
</pallas_src>

<mosaic_0001>
module attributes {stable_mosaic.version = 11 : i64} {
  func.func @_dyt_kernel(%arg0: i32, %arg1: memref<8x128xf32, #tpu.memory_space<vmem>>, %arg2: memref<4x128xf32, #tpu.memory_space<vmem>>, %arg3: memref<8x128xf32, #tpu.memory_space<vmem>>) attributes {dimension_semantics = [#tpu.dimension_semantics<parallel>], iteration_bounds = array<i64: 1>, scalar_prefetch = 0 : i64, scratch_operands = 0 : i64, tpu.core_type = #tpu.core_type<tc>, window_params = [{transform_indices = @transform_0, window_bounds = array<i64: 8, 128>}, {pipeline_mode = #tpu.pipeline_mode<synchronous>, transform_indices = @transform_1, window_bounds = array<i64: 4, 128>}, {transform_indices = @transform_2, window_bounds = array<i64: 8, 128>}]} {
    %c0 = arith.constant 0 : index
    %c0_0 = arith.constant 0 : index
    %0 = vector.load %arg1[%c0, %c0_0] : memref<8x128xf32, #tpu.memory_space<vmem>>, vector<8x128xf32>
    %c0_1 = arith.constant 0 : index
    %c0_2 = arith.constant 0 : index
    %1 = vector.load %arg2[%c0_1, %c0_2] : memref<4x128xf32, #tpu.memory_space<vmem>>, vector<4x128xf32>
    %2 = vector.extract_strided_slice %1 {offsets = [0, 0], sizes = [1, 128], strides = [1, 1]} : vector<4x128xf32> to vector<1x128xf32>
    %3 = vector.extract_strided_slice %1 {offsets = [1, 0], sizes = [1, 128], strides = [1, 1]} : vector<4x128xf32> to vector<1x128xf32>
    %4 = vector.extract_strided_slice %1 {offsets = [2, 0], sizes = [1, 128], strides = [1, 1]} : vector<4x128xf32> to vector<1x128xf32>
    %5 = vector.extract_strided_slice %1 {offsets = [3, 0], sizes = [1, 128], strides = [1, 1]} : vector<4x128xf32> to vector<1x128xf32>
    %6 = vector.broadcast %2 : vector<1x128xf32> to vector<8x128xf32>
    %7 = arith.mulf %6, %0 : vector<8x128xf32>
    %8 = vector.broadcast %4 : vector<1x128xf32> to vector<8x128xf32>
    %9 = arith.addf %7, %8 : vector<8x128xf32>
    %10 = math.tanh %9 : vector<8x128xf32>
    %11 = vector.broadcast %3 : vector<1x128xf32> to vector<8x128xf32>
    %12 = arith.mulf %11, %10 : vector<8x128xf32>
    %13 = vector.broadcast %5 : vector<1x128xf32> to vector<8x128xf32>
    %14 = arith.addf %12, %13 : vector<8x128xf32>
    %c0_3 = arith.constant 0 : index
    %c0_4 = arith.constant 0 : index
    %15 = vector.load %arg3[%c0_3, %c0_4] : memref<8x128xf32, #tpu.memory_space<vmem>>, vector<8x128xf32>
    tpu.vector_store %arg3[%c0_3, %c0_4], %14 {strides = array<i32>} : memref<8x128xf32, #tpu.memory_space<vmem>>, vector<8x128xf32>,
    return
  }
  func.func @transform_0(%arg0: i32) -> (i32, i32) {
    %c0_i32 = arith.constant 0 : i32
    %c0_i32_0 = arith.constant 0 : i32
    return %arg0, %c0_i32 : i32, i32
  }
  func.func @transform_1(%arg0: i32) -> (i32, i32) {
    %c0_i32 = arith.constant 0 : i32
    %c0_i32_0 = arith.constant 0 : i32
    %c0_i32_1 = arith.constant 0 : i32
    return %c0_i32, %c0_i32_0 : i32, i32
  }
  func.func @transform_2(%arg0: i32) -> (i32, i32) {
    %c0_i32 = arith.constant 0 : i32
    %c0_i32_0 = arith.constant 0 : i32
    return %arg0, %c0_i32 : i32, i32
  }
}

</mosaic_0001>

<bundles_post_ra>
// kernel: tpu_custom_call.1
= control target key start
LH: loop header
LB: loop body
LE: loop exit
PB: predicated region body
PF: predicated region fallthrough
CT: control target
= control target key end

     0   :  { %7 = vsyncpa [#allocation3], 0  ;;  %s207_s0 = inlined_call_operand.hbm [shape: f32[8,128], index: 0, kind: input, shape index: {}]   ;;  %s208_s1 = inlined_call_operand.hbm [shape: f32[4,128], index: 1, kind: input, shape index: {}]   ;;  %s209_s2 = inlined_call_operand.hbm [shape: f32[8,128], index: 2, kind: output, shape index: {}]  }
   0x1   :  { %8 = vsyncpa [#allocation6], 0 }
   0x2   :  { %9 = vsyncpa [#allocation4], 0  ;;  %s153_s9 = smov [#allocation2]   ;;  %s154_s11 = smov [#allocation5]  }
   0x3   :  { %s16_s10 = sshll.u32 %s153_s9, 4  ;;  %s26_s12 = sshll.u32 %s154_s11, 4  ;;  %s17_s10 = int_to_ptr.vmem [resolvable:$true] %s16_s10  ;;  %s27_s12 = int_to_ptr.vmem [resolvable:$true] %s26_s12 }
   0x4   :  { %s81_s15 = scalar_lea.hbm %s207_s0, 128 }
   0x5   :  { %p82_p0 = scmp.ne.s32.totalorder %s207_s0, %s81_s15  ;;  %p85_p1 = scmp.lt.u32.totalorder %s81_s15, %s207_s0 }
   0x7   :  { %p87_p2 = pnand %p85_p1, %p82_p0 }
   0x9   :  { %90 = shalt.err (!%p87_p2)
}
   0xa   :  { %s91_s20 = scalar_lea.vmem %s17_s10, 128  ;;  %p96_p4 = scmp.lt.s32.totalorder %s17_s10, %s17_s10 }
   0xb   :  { %p92_p3 = scmp.ne.s32.totalorder %s17_s10, %s91_s20  ;;  %p97_p5 = scmp.lt.s32.totalorder %s91_s20, %s91_s20 }
   0xd   :  { %p98_p6 = por %p97_p5, %p96_p4 }
   0xf   :  { %p99_p7 = pnand %p98_p6, %p92_p3 }
  0x11   :  { %102 = shalt.err (!%p99_p7)
}
  0x12   :  { %19 = dma.hbm_to_vmem [thread:$0]  %s207_s0, 128, %s17_s10, [#allocation3]  }
  0x13   :  { %s103_s25 = scalar_lea.hbm %s208_s1, 64 }
  0x14   :  { %p104_p8 = scmp.ne.s32.totalorder %s208_s1, %s103_s25  ;;  %p107_p9 = scmp.lt.u32.totalorder %s103_s25, %s208_s1 }
  0x16   :  { %p109_p10 = pnand %p107_p9, %p104_p8 }
  0x18   :  { %112 = shalt.err (!%p109_p10)
}
  0x19   :  { %s113_s30 = scalar_lea.vmem %s27_s12, 64  ;;  %p118_p12 = scmp.lt.s32.totalorder %s27_s12, %s27_s12 }
  0x1a   :  { %p114_p11 = scmp.ne.s32.totalorder %s27_s12, %s113_s30  ;;  %p119_p13 = scmp.lt.s32.totalorder %s113_s30, %s113_s30 }
  0x1c   :  { %p120_p0 = por %p119_p13, %p118_p12 }
  0x1e   :  { %p121_p1 = pnand %p120_p0, %p114_p11 }
  0x20   :  { %124 = shalt.err (!%p121_p1)
}
  0x21   :  { %29 = dma.hbm_to_vmem [thread:$0]  %s208_s1, 64, %s27_s12, [#allocation6]  }
  0x22   :  { %147 = dma.done.wait [#allocation3], 128  }
  0x23   :  { %148 = vsyncadd [#allocation3], 4294967168 }
  0x24   :  { %149 = dma.done.wait [#allocation6], 64  }
  0x25   :  { %150 = vsyncadd [#allocation6], 4294967232  ;;  %v38_v0 = vlaneseq  ;;  %v36_v4 = vld [vmem:[#allocation2] sm:$0xff]  ;;  %v37_v5 = vld [vmem:[#allocation5] sm:$0xf]  ;;  %s155_s1 = smov [#allocation7]  }
  0x26   :  { %s66_s4 = sshll.u32 %s155_s1, 4  ;;  %s67_s4 = int_to_ptr.vmem [resolvable:$true] %s66_s4 }
  0x27   :  { %v39_v1 = vshrl.u32 %v38_v0, 7  ;;  %s125_s5 = scalar_lea.vmem %s67_s4, 128  ;;  %p130_p3 = scmp.lt.s32.totalorder %s67_s4, %s67_s4 }
  0x28   :  { %p126_p2 = scmp.ne.s32.totalorder %s67_s4, %s125_s5  ;;  %p131_p4 = scmp.lt.s32.totalorder %s125_s5, %s125_s5 }
  0x29   :  { %v40_v2 = vsub.s32 0, %v39_v1  ;;  %v45_v3 = vsub.s32 2, %v39_v1  ;;  %v51_v10 = vsub.s32 1, %v39_v1  ;;  %v56_v11 = vsub.s32 3, %v39_v1 }
  0x2a   :  { %p132_p5 = por %p131_p4, %p130_p3 }
  0x2b   :  { %v41_v6 = vrot.slane %v37_v5, %v40_v2  ;;  %v46_v7 = vrot.slane %v37_v5, %v45_v3  ;;  %v52_v12 = vrot.slane %v37_v5, %v51_v10  ;;  %v57_v13 = vrot.slane %v37_v5, %v56_v11 }
  0x2c   :  { %p133_p6 = pnand %p132_p5, %p126_p2 }
  0x2d   :  { %v42_v8 = vmul.f32 %v41_v6, %v36_v4 }
  0x2f   :  { %v47_v9 = vadd.f32 %v46_v7, %v42_v8 }
  0x31   :  { %79 = vtanh.f32 %v47_v9 }
  0x3b   :  { %v80_v14 = vpop.eup %79 }
  0x3c   :  { %v53_v15 = vmul.f32 %v80_v14, %v52_v12 }
  0x3e   :  { %v58_v16 = vadd.f32 %v57_v13, %v53_v15 }
  0x40   :  { %59 = vst [vmem:[#allocation7] sm:$0xff] %v58_v16 }
  0x41   :  { %136 = shalt.err (!%p133_p6)
}
  0x42   :  { %s137_s8 = scalar_lea.hbm %s209_s2, 128 }
  0x43   :  { %p138_p7 = scmp.ne.s32.totalorder %s209_s2, %s137_s8  ;;  %p141_p8 = scmp.lt.u32.totalorder %s137_s8, %s209_s2 }
  0x45   :  { %p143_p9 = pnand %p141_p8, %p138_p7 }
  0x47   :  { %146 = shalt.err (!%p143_p9)
}
  0x48   :  { %69 = dma.vmem_to_hbm [thread:$0]  %s67_s4, 128, %s209_s2, [#allocation4]  }
  0x49   :  { %151 = dma.done.wait [#allocation4], 128  }
  0x4a   :  { %152 = vsyncadd [#allocation4], 4294967168 }
  0x4b   :  { %73 = vsyncpa [#allocation3], 1 }
  0x4c   :  { %74 = vsyncpa [#allocation6], 1 }
  0x4d   :  { %75 = vsyncpa [#allocation4], 1 }

</bundles_post_ra>
